<compile_context>
chip_gen: v7x
topology: tpu7x:2x2x1
jax: 0.10.0
libtpu: 0.0.40
codegen_flags: <defaults>
</compile_context>

<pallas_src>
import jax
import jax.numpy as jnp
from jax.experimental import pallas as pl
from jax.experimental.pallas import tpu as pltpu

LN_EPS = 1e-5


def _layer_norm_1pass(x, gamma, beta):
    """One-pass LayerNorm over the last dim (sum and sum-of-squares off the same operand)."""
    inv_f = 1.0 / x.shape[-1]
    s = jnp.sum(x, axis=-1, keepdims=True)
    ss = jnp.sum(x * x, axis=-1, keepdims=True)
    mean = s * inv_f
    var = ss * inv_f - mean * mean
    return (x - mean) * jax.lax.rsqrt(var + LN_EPS) * gamma + beta


def _shift_rows(x, direction):
    """Rotate rows by one: direction=+1 -> row i gets row i-1 ("prev"),
    direction=-1 -> row i gets row i+1 ("next"). Static slices + concat only
    (no negative-shift roll); the wrapped row is zeroed by the caller's edge mask."""
    if direction > 0:
        return jnp.concatenate([x[-1:], x[:-1]], axis=0)
    return jnp.concatenate([x[1:], x[:1]], axis=0)


def mel_encoder_kernel(lens_ref,                       # scalar prefetch: (B,) int32 in SMEM
                       x_ref,                          # (BB, T, H) f32
                       w1_ref, b1_ref, g1_ref, be1_ref,
                       w2_ref, b2_ref, g2_ref, be2_ref,
                       o_ref):                         # (BB, T, F) f32
    BB, T, H = x_ref.shape
    F = o_ref.shape[-1]
    M = BB * T
    blk = pl.program_id(0)

    x = x_ref[...].reshape(M, H)                       # flatten packed sequences

    row = jax.lax.broadcasted_iota(jnp.int32, (M, 1), 0)
    t_idx = row % T
    prev_ok = jnp.where(t_idx == 0, 0.0, 1.0)          # zero "prev" tap at each seq start
    next_ok = jnp.where(t_idx == T - 1, 0.0, 1.0)      # zero "next" tap at each seq end

    # ---- conv1 (k=3, pad=1): one (M, 3H) x (3H, F) bf16 matmul, f32 accumulation ----
    x_cat = jnp.concatenate([_shift_rows(x, +1) * prev_ok,
                             x,
                             _shift_rows(x, -1) * next_ok], axis=1)
    h = jnp.dot(x_cat.astype(jnp.bfloat16), w1_ref[...],
                preferred_element_type=jnp.float32) + b1_ref[...]
    h = jnp.maximum(h, 0.0)                            # relu1
    h = _layer_norm_1pass(h, g1_ref[...], be1_ref[...])
    # dropout1: identity in eval mode

    # ---- conv2 (k=3, pad=1): one (M, 3F) x (3F, F) bf16 matmul ----
    h_cat = jnp.concatenate([_shift_rows(h, +1) * prev_ok,
                             h,
                             _shift_rows(h, -1) * next_ok], axis=1)
    y = jnp.dot(h_cat.astype(jnp.bfloat16), w2_ref[...],
                preferred_element_type=jnp.float32) + b2_ref[...]
    y = jnp.maximum(y, 0.0)                            # relu2
    y = _layer_norm_1pass(y, g2_ref[...], be2_ref[...])
    # dropout2: identity in eval mode

    # ---- masked_fill(mask == 0, 0.0): rebuild frame mask from lengths in SMEM ----
    keep = jnp.zeros((M, 1), jnp.float32)
    for bb in range(BB):                               # static, BB is small
        seq_len = lens_ref[blk * BB + bb]
        in_seq = (row >= bb * T) & (row < (bb + 1) * T)
        keep = jnp.where(in_seq & (t_idx < seq_len), 1.0, keep)
    y = y * keep

    o_ref[...] = y.reshape(BB, T, F).astype(o_ref.dtype)


def _pick_batch_block(B, T):
    """Pack sequences per grid step so the matmul M dim is reasonably full (~256 rows),
    but keep >= 2 grid steps when B > 1 so both v7x TensorCores / the grid pipeline get work."""
    bb = min(B, max(1, 256 // max(T, 1)))
    if B > 1:
        bb = min(bb, max(1, B // 2))
    while B % bb:
        bb -= 1
    return bb


def mel_encoder(x, lengths, params, *, batch_block=None, interpret=False):
    """x: (B,T,H) f32; lengths: (B,) int32 valid-frame counts; params: dict of f32 weights."""
    B, T, H = x.shape
    F = params["b1"].shape[-1]
    BB = batch_block or _pick_batch_block(B, T)
    assert B % BB == 0, "batch_block must divide B"

    # Pre-fuse the 3 conv taps into one wide-K operand; cast weights to bf16 (MXU native).
    w1 = params["w1"].reshape(3 * H, F).astype(jnp.bfloat16)
    w2 = params["w2"].reshape(3 * F, F).astype(jnp.bfloat16)

    def _const(shape):
        # Parameters: block index never changes across the grid -> single buffer.
        return pl.BlockSpec(shape, lambda b, lens: (0,) * len(shape),
                            pipeline_mode=pl.Buffered(1))

    # Rough per-step VMEM budget: double-buffered activation blocks + resident (single-
    # buffered) weights + live (M,F)/(M,3F) intermediates + headroom; kept under v7x's 64 MiB.
    act_in = BB * T * H * 4
    act_out = BB * T * F * 4
    wts = (3 * H * F + 3 * F * F) * 2 + 6 * F * 4
    live = 8 * BB * T * F * 4
    vmem_bytes = min(max(2 * (act_in + act_out) + wts + live + (4 << 20), 16 << 20), 48 << 20)

    grid_spec = pltpu.PrefetchScalarGridSpec(
        num_scalar_prefetch=1,
        grid=(B // BB,),
        in_specs=[
            pl.BlockSpec((BB, T, H), lambda b, lens: (b, 0, 0)),
            _const((3 * H, F)), _const((1, F)), _const((1, F)), _const((1, F)),
            _const((3 * F, F)), _const((1, F)), _const((1, F)), _const((1, F)),
        ],
        out_specs=pl.BlockSpec((BB, T, F), lambda b, lens: (b, 0, 0)),
    )

    return pl.pallas_call(
        mel_encoder_kernel,
        out_shape=jax.ShapeDtypeStruct((B, T, F), x.dtype),
        grid_spec=grid_spec,
        compiler_params=pltpu.CompilerParams(
            dimension_semantics=("parallel",),
            vmem_limit_bytes=vmem_bytes),
        interpret=interpret,
    )(lengths.astype(jnp.int32), x, w1,
      params["b1"], params["g1"], params["be1"],
      w2, params["b2"], params["g2"], params["be2"])


def mel_encoder_ref(x, lengths, params):
    """Pure-JAX f32 reference (same math, no Pallas)."""
    def conv1d_k3(h, w, b):                            # h: (B,T,Cin), w: (3,Cin,Cout)
        p = jnp.pad(h, ((0, 0), (1, 1), (0, 0)))
        return p[:, :-2] @ w[0] + p[:, 1:-1] @ w[1] + p[:, 2:] @ w[2] + b
    def ln(h, g, be):
        m = jnp.mean(h, -1, keepdims=True)
        v = jnp.mean((h - m) ** 2, -1, keepdims=True)
        return (h - m) * jax.lax.rsqrt(v + LN_EPS) * g + be
    h = ln(jnp.maximum(conv1d_k3(x, params["w1"], params["b1"]), 0.0),
           params["g1"], params["be1"])
    y = ln(jnp.maximum(conv1d_k3(h, params["w2"], params["b2"]), 0.0),
           params["g2"], params["be2"])
    T = x.shape[1]
    keep = jnp.arange(T)[None, :, None] < lengths[:, None, None]
    return jnp.where(keep, y, 0.0)


def init_params(key, H, F):
    ks = jax.random.split(key, 8)
    return {
        # conv weights stored as (k, C_in, C_out) == torch Conv1d weight.permute(2, 1, 0)
        "w1": jax.random.normal(ks[0], (3, H, F), jnp.float32) * 0.05,
        "b1": jax.random.normal(ks[1], (1, F), jnp.float32) * 0.01,
        "g1": 1.0 + jax.random.normal(ks[2], (1, F), jnp.float32) * 0.01,
        "be1": jax.random.normal(ks[3], (1, F), jnp.float32) * 0.01,
        "w2": jax.random.normal(ks[4], (3, F, F), jnp.float32) * 0.05,
        "b2": jax.random.normal(ks[5], (1, F), jnp.float32) * 0.01,
        "g2": 1.0 + jax.random.normal(ks[6], (1, F), jnp.float32) * 0.01,
        "be2": jax.random.normal(ks[7], (1, F), jnp.float32) * 0.01,
    }


if __name__ == "__main__":
    B, T, H, F = 2, 16, 32, 256   # encoder_hidden_size=32, filter_size=256
    key = jax.random.PRNGKey(0)
    kx, kp = jax.random.split(key, 2)

    x = jax.random.normal(kx, (B, T, H), jnp.float32)
    lengths = jnp.array([T, T - 4], dtype=jnp.int32)   # second sequence has 4 padded frames
    params = init_params(kp, H, F)

    out = jax.block_until_ready(mel_encoder(x, lengths, params))
    ref = mel_encoder_ref(x, lengths, params)

    assert out.shape == (B, T, F)
    # matmuls use bf16 MXU inputs with f32 accumulation -> loosened tolerance vs f32 reference
    max_err = float(jnp.max(jnp.abs(out - ref)))
    assert jnp.allclose(out, ref, atol=7.5e-2, rtol=7.5e-2), f"mismatch, max_err={max_err}"

    print("KERNEL_OK")
</pallas_src>

<mosaic_0001>
module attributes {stable_mosaic.version = 11 : i64} {
  func.func @mel_encoder_kernel(%arg0: i32, %arg1: memref<2xi32, #tpu.memory_space<smem>>, %arg2: memref<1x16x32xf32, #tpu.memory_space<vmem>>, %arg3: memref<96x256xbf16, #tpu.memory_space<vmem>>, %arg4: memref<1x256xf32, #tpu.memory_space<vmem>>, %arg5: memref<1x256xf32, #tpu.memory_space<vmem>>, %arg6: memref<1x256xf32, #tpu.memory_space<vmem>>, %arg7: memref<768x256xbf16, #tpu.memory_space<vmem>>, %arg8: memref<1x256xf32, #tpu.memory_space<vmem>>, %arg9: memref<1x256xf32, #tpu.memory_space<vmem>>, %arg10: memref<1x256xf32, #tpu.memory_space<vmem>>, %arg11: memref<1x16x256xf32, #tpu.memory_space<vmem>>) attributes {dimension_semantics = [#tpu.dimension_semantics<parallel>], iteration_bounds = array<i64: 2>, scalar_prefetch = 1 : i64, scratch_operands = 0 : i64, tpu.core_type = #tpu.core_type<tc>, window_params = [{transform_indices = @transform_0, window_bounds = array<i64: 1, 16, 32>}, {pipeline_mode = #tpu.pipeline_mode<synchronous>, transform_indices = @transform_1, window_bounds = array<i64: 96, 256>}, {pipeline_mode = #tpu.pipeline_mode<synchronous>, transform_indices = @transform_2, window_bounds = array<i64: 1, 256>}, {pipeline_mode = #tpu.pipeline_mode<synchronous>, transform_indices = @transform_3, window_bounds = array<i64: 1, 256>}, {pipeline_mode = #tpu.pipeline_mode<synchronous>, transform_indices = @transform_4, window_bounds = array<i64: 1, 256>}, {pipeline_mode = #tpu.pipeline_mode<synchronous>, transform_indices = @transform_5, window_bounds = array<i64: 768, 256>}, {pipeline_mode = #tpu.pipeline_mode<synchronous>, transform_indices = @transform_6, window_bounds = array<i64: 1, 256>}, {pipeline_mode = #tpu.pipeline_mode<synchronous>, transform_indices = @transform_7, window_bounds = array<i64: 1, 256>}, {pipeline_mode = #tpu.pipeline_mode<synchronous>, transform_indices = @transform_8, window_bounds = array<i64: 1, 256>}, {transform_indices = @transform_9, window_bounds = array<i64: 1, 16, 256>}]} {
    %c0 = arith.constant 0 : index
    %c0_0 = arith.constant 0 : index
    %c0_1 = arith.constant 0 : index
    %0 = vector.load %arg2[%c0, %c0_0, %c0_1] : memref<1x16x32xf32, #tpu.memory_space<vmem>>, vector<1x16x32xf32>
    %1 = vector.shape_cast %0 : vector<1x16x32xf32> to vector<16x32xf32>
    %2 = tpu.iota {dimensions = array<i32: 0>} : vector<16x1xi32>
    %c16_i32 = arith.constant 16 : i32
    %c0_i32 = arith.constant 0 : i32
    %3 = arith.cmpi eq, %c16_i32, %c0_i32 : i32
    %c1_i32 = arith.constant 1 : i32
    %4 = arith.select %3, %c1_i32, %c16_i32 : i32
    %5 = vector.broadcast %4 : i32 to vector<16x1xi32>
    %6 = arith.remsi %2, %5 : vector<16x1xi32>
    %c0_i32_2 = arith.constant 0 : i32
    %7 = vector.broadcast %c0_i32_2 : i32 to vector<16x1xi32>
    %8 = arith.cmpi ne, %6, %7 : vector<16x1xi32>
    %c0_i32_3 = arith.constant 0 : i32
    %9 = vector.broadcast %c0_i32_3 : i32 to vector<16x1xi32>
    %10 = arith.cmpi slt, %6, %9 : vector<16x1xi32>
    %c0_i32_4 = arith.constant 0 : i32
    %11 = arith.cmpi slt, %4, %c0_i32_4 : i32
    %12 = vector.broadcast %11 : i1 to vector<16x1xi1>
    %13 = vector.broadcast %12 : vector<16x1xi1> to vector<16x1xi1>
    %14 = arith.xori %10, %13 : vector<16x1xi1>
    %15 = arith.andi %14, %8 : vector<16x1xi1>
    %16 = vector.broadcast %4 : i32 to vector<16x1xi32>
    %17 = arith.addi %6, %16 : vector<16x1xi32>
    %18 = arith.select %15, %17, %6 : vector<16x1xi1>, vector<16x1xi32>
    %c0_i32_5 = arith.constant 0 : i32
    %19 = vector.broadcast %c0_i32_5 : i32 to vector<16x1xi32>
    %20 = arith.cmpi eq, %18, %19 : vector<16x1xi32>
    %cst = arith.constant 0.000000e+00 : f32
    %cst_6 = arith.constant 1.000000e+00 : f32
    %21 = vector.broadcast %cst : f32 to vector<16x1xf32>
    %22 = vector.broadcast %cst_6 : f32 to vector<16x1xf32>
    %23 = arith.select %20, %21, %22 : vector<16x1xi1>, vector<16x1xf32>
    %c15_i32 = arith.constant 15 : i32
    %24 = vector.broadcast %c15_i32 : i32 to vector<16x1xi32>
    %25 = arith.cmpi eq, %18, %24 : vector<16x1xi32>
    %cst_7 = arith.constant 0.000000e+00 : f32
    %cst_8 = arith.constant 1.000000e+00 : f32
    %26 = vector.broadcast %cst_7 : f32 to vector<16x1xf32>
    %27 = vector.broadcast %cst_8 : f32 to vector<16x1xf32>
    %28 = arith.select %25, %26, %27 : vector<16x1xi1>, vector<16x1xf32>
    %29 = vector.extract_strided_slice %1 {offsets = [15, 0], sizes = [1, 32], strides = [1, 1]} : vector<16x32xf32> to vector<1x32xf32>
    %30 = vector.extract_strided_slice %1 {offsets = [0, 0], sizes = [15, 32], strides = [1, 1]} : vector<16x32xf32> to vector<15x32xf32>
    %31 = tpu.concatenate %29, %30 in 0 : vector<1x32xf32>, vector<15x32xf32> -> vector<16x32xf32>
    %32 = vector.broadcast %23 : vector<16x1xf32> to vector<16x32xf32>
    %33 = arith.mulf %31, %32 : vector<16x32xf32>
    %34 = vector.extract_strided_slice %1 {offsets = [1, 0], sizes = [15, 32], strides = [1, 1]} : vector<16x32xf32> to vector<15x32xf32>
    %35 = vector.extract_strided_slice %1 {offsets = [0, 0], sizes = [1, 32], strides = [1, 1]} : vector<16x32xf32> to vector<1x32xf32>
    %36 = tpu.concatenate %34, %35 in 0 : vector<15x32xf32>, vector<1x32xf32> -> vector<16x32xf32>
    %37 = vector.broadcast %28 : vector<16x1xf32> to vector<16x32xf32>
    %38 = arith.mulf %36, %37 : vector<16x32xf32>
    %39 = tpu.concatenate %33, %1, %38 in 1 : vector<16x32xf32>, vector<16x32xf32>, vector<16x32xf32> -> vector<16x96xf32>
    %40 = arith.truncf %39 : vector<16x96xf32> to vector<16x96xbf16>
    %c0_9 = arith.constant 0 : index
    %c0_10 = arith.constant 0 : index
    %41 = vector.load %arg3[%c0_9, %c0_10] : memref<96x256xbf16, #tpu.memory_space<vmem>>, vector<96x256xbf16>
    %cst_11 = arith.constant dense<0.000000e+00> : vector<16x256xf32>
    %42 = tpu.matmul %40, %41, %cst_11 {dimension_numbers = #tpu.dot_dimension_numbers<[1], [0], [0], [1], [0, 0, 1, 1], [], []>} : vector<16x96xbf16>, vector<96x256xbf16>, vector<16x256xf32> -> vector<16x256xf32>
    %c0_12 = arith.constant 0 : index
    %c0_13 = arith.constant 0 : index
    %43 = vector.load %arg4[%c0_12, %c0_13] : memref<1x256xf32, #tpu.memory_space<vmem>>, vector<1x256xf32>
    %44 = vector.broadcast %43 : vector<1x256xf32> to vector<16x256xf32>
    %45 = arith.addf %42, %44 : vector<16x256xf32>
    %cst_14 = arith.constant 0.000000e+00 : f32
    %46 = vector.broadcast %cst_14 : f32 to vector<16x256xf32>
    %47 = arith.maximumf %45, %46 : vector<16x256xf32>
    %c0_15 = arith.constant 0 : index
    %c0_16 = arith.constant 0 : index
    %48 = vector.load %arg5[%c0_15, %c0_16] : memref<1x256xf32, #tpu.memory_space<vmem>>, vector<1x256xf32>
    %c0_17 = arith.constant 0 : index
    %c0_18 = arith.constant 0 : index
    %49 = vector.load %arg6[%c0_17, %c0_18] : memref<1x256xf32, #tpu.memory_space<vmem>>, vector<1x256xf32>
    %cst_19 = arith.constant dense<0.000000e+00> : vector<16xf32>
    %50 = vector.multi_reduction <add>, %47, %cst_19 [1] : vector<16x256xf32> to vector<16xf32>
    %51 = vector.shape_cast %50 : vector<16xf32> to vector<16x1xf32>
    %52 = arith.mulf %47, %47 : vector<16x256xf32>
    %cst_20 = arith.constant dense<0.000000e+00> : vector<16xf32>
    %53 = vector.multi_reduction <add>, %52, %cst_20 [1] : vector<16x256xf32> to vector<16xf32>
    %54 = vector.shape_cast %53 : vector<16xf32> to vector<16x1xf32>
    %cst_21 = arith.constant 3.906250e-03 : f32
    %55 = vector.broadcast %cst_21 : f32 to vector<16x1xf32>
    %56 = arith.mulf %51, %55 : vector<16x1xf32>
    %cst_22 = arith.constant 3.906250e-03 : f32
    %57 = vector.broadcast %cst_22 : f32 to vector<16x1xf32>
    %58 = arith.mulf %54, %57 : vector<16x1xf32>
    %59 = arith.mulf %56, %56 : vector<16x1xf32>
    %60 = arith.subf %58, %59 : vector<16x1xf32>
    %61 = vector.broadcast %56 : vector<16x1xf32> to vector<16x256xf32>
    %62 = arith.subf %47, %61 : vector<16x256xf32>
    %cst_23 = arith.constant 9.99999974E-6 : f32
    %63 = vector.broadcast %cst_23 : f32 to vector<16x1xf32>
    %64 = arith.addf %60, %63 : vector<16x1xf32>
    %65 = math.rsqrt %64 : vector<16x1xf32>
    %66 = vector.broadcast %65 : vector<16x1xf32> to vector<16x256xf32>
    %67 = arith.mulf %62, %66 : vector<16x256xf32>
    %68 = vector.broadcast %48 : vector<1x256xf32> to vector<16x256xf32>
    %69 = arith.mulf %67, %68 : vector<16x256xf32>
    %70 = vector.broadcast %49 : vector<1x256xf32> to vector<16x256xf32>
    %71 = arith.addf %69, %70 : vector<16x256xf32>
    %72 = vector.extract_strided_slice %71 {offsets = [15, 0], sizes = [1, 256], strides = [1, 1]} : vector<16x256xf32> to vector<1x256xf32>
    %73 = vector.extract_strided_slice %71 {offsets = [0, 0], sizes = [15, 256], strides = [1, 1]} : vector<16x256xf32> to vector<15x256xf32>
    %74 = tpu.concatenate %72, %73 in 0 : vector<1x256xf32>, vector<15x256xf32> -> vector<16x256xf32>
    %75 = vector.broadcast %23 : vector<16x1xf32> to vector<16x256xf32>
    %76 = arith.mulf %74, %75 : vector<16x256xf32>
    %77 = vector.extract_strided_slice %71 {offsets = [1, 0], sizes = [15, 256], strides = [1, 1]} : vector<16x256xf32> to vector<15x256xf32>
    %78 = vector.extract_strided_slice %71 {offsets = [0, 0], sizes = [1, 256], strides = [1, 1]} : vector<16x256xf32> to vector<1x256xf32>
    %79 = tpu.concatenate %77, %78 in 0 : vector<15x256xf32>, vector<1x256xf32> -> vector<16x256xf32>
    %80 = vector.broadcast %28 : vector<16x1xf32> to vector<16x256xf32>
    %81 = arith.mulf %79, %80 : vector<16x256xf32>
    %82 = tpu.concatenate %76, %71, %81 in 1 : vector<16x256xf32>, vector<16x256xf32>, vector<16x256xf32> -> vector<16x768xf32>
    %83 = arith.truncf %82 : vector<16x768xf32> to vector<16x768xbf16>
    %c0_24 = arith.constant 0 : index
    %c0_25 = arith.constant 0 : index
    %84 = vector.load %arg7[%c0_24, %c0_25] : memref<768x256xbf16, #tpu.memory_space<vmem>>, vector<768x256xbf16>
    %cst_26 = arith.constant dense<0.000000e+00> : vector<16x256xf32>
    %85 = tpu.matmul %83, %84, %cst_26 {dimension_numbers = #tpu.dot_dimension_numbers<[1], [0], [0], [1], [0, 0, 1, 1], [], []>} : vector<16x768xbf16>, vector<768x256xbf16>, vector<16x256xf32> -> vector<16x256xf32>
    %c0_27 = arith.constant 0 : index
    %c0_28 = arith.constant 0 : index
    %86 = vector.load %arg8[%c0_27, %c0_28] : memref<1x256xf32, #tpu.memory_space<vmem>>, vector<1x256xf32>
    %87 = vector.broadcast %86 : vector<1x256xf32> to vector<16x256xf32>
    %88 = arith.addf %85, %87 : vector<16x256xf32>
    %cst_29 = arith.constant 0.000000e+00 : f32
    %89 = vector.broadcast %cst_29 : f32 to vector<16x256xf32>
    %90 = arith.maximumf %88, %89 : vector<16x256xf32>
    %c0_30 = arith.constant 0 : index
    %c0_31 = arith.constant 0 : index
    %91 = vector.load %arg9[%c0_30, %c0_31] : memref<1x256xf32, #tpu.memory_space<vmem>>, vector<1x256xf32>
    %c0_32 = arith.constant 0 : index
    %c0_33 = arith.constant 0 : index
    %92 = vector.load %arg10[%c0_32, %c0_33] : memref<1x256xf32, #tpu.memory_space<vmem>>, vector<1x256xf32>
    %cst_34 = arith.constant dense<0.000000e+00> : vector<16xf32>
    %93 = vector.multi_reduction <add>, %90, %cst_34 [1] : vector<16x256xf32> to vector<16xf32>
    %94 = vector.shape_cast %93 : vector<16xf32> to vector<16x1xf32>
    %95 = arith.mulf %90, %90 : vector<16x256xf32>
    %cst_35 = arith.constant dense<0.000000e+00> : vector<16xf32>
    %96 = vector.multi_reduction <add>, %95, %cst_35 [1] : vector<16x256xf32> to vector<16xf32>
    %97 = vector.shape_cast %96 : vector<16xf32> to vector<16x1xf32>
    %cst_36 = arith.constant 3.906250e-03 : f32
    %98 = vector.broadcast %cst_36 : f32 to vector<16x1xf32>
    %99 = arith.mulf %94, %98 : vector<16x1xf32>
    %cst_37 = arith.constant 3.906250e-03 : f32
    %100 = vector.broadcast %cst_37 : f32 to vector<16x1xf32>
    %101 = arith.mulf %97, %100 : vector<16x1xf32>
    %102 = arith.mulf %99, %99 : vector<16x1xf32>
    %103 = arith.subf %101, %102 : vector<16x1xf32>
    %104 = vector.broadcast %99 : vector<16x1xf32> to vector<16x256xf32>
    %105 = arith.subf %90, %104 : vector<16x256xf32>
    %cst_38 = arith.constant 9.99999974E-6 : f32
    %106 = vector.broadcast %cst_38 : f32 to vector<16x1xf32>
    %107 = arith.addf %103, %106 : vector<16x1xf32>
    %108 = math.rsqrt %107 : vector<16x1xf32>
    %109 = vector.broadcast %108 : vector<16x1xf32> to vector<16x256xf32>
    %110 = arith.mulf %105, %109 : vector<16x256xf32>
    %111 = vector.broadcast %91 : vector<1x256xf32> to vector<16x256xf32>
    %112 = arith.mulf %110, %111 : vector<16x256xf32>
    %113 = vector.broadcast %92 : vector<1x256xf32> to vector<16x256xf32>
    %114 = arith.addf %112, %113 : vector<16x256xf32>
    %cst_39 = arith.constant 0.000000e+00 : f32
    %115 = vector.broadcast %cst_39 : f32 to vector<16x1xf32>
    %c1_i32_40 = arith.constant 1 : i32
    %116 = arith.muli %arg0, %c1_i32_40 : i32
    %c0_i32_41 = arith.constant 0 : i32
    %117 = arith.addi %116, %c0_i32_41 : i32
    %118 = arith.index_cast %117 : i32 to index
    %119 = memref.load %arg1[%118] : memref<2xi32, #tpu.memory_space<smem>>
    %c0_i32_42 = arith.constant 0 : i32
    %120 = vector.broadcast %c0_i32_42 : i32 to vector<16x1xi32>
    %121 = arith.cmpi sge, %2, %120 : vector<16x1xi32>
    %c16_i32_43 = arith.constant 16 : i32
    %122 = vector.broadcast %c16_i32_43 : i32 to vector<16x1xi32>
    %123 = arith.cmpi slt, %2, %122 : vector<16x1xi32>
    %124 = arith.andi %121, %123 : vector<16x1xi1>
    %125 = vector.broadcast %119 : i32 to vector<16x1xi32>
    %126 = arith.cmpi slt, %18, %125 : vector<16x1xi32>
    %127 = arith.andi %124, %126 : vector<16x1xi1>
    %cst_44 = arith.constant 1.000000e+00 : f32
    %128 = vector.broadcast %cst_44 : f32 to vector<16x1xf32>
    %129 = arith.select %127, %128, %115 : vector<16x1xi1>, vector<16x1xf32>
    %130 = vector.broadcast %129 : vector<16x1xf32> to vector<16x256xf32>
    %131 = arith.mulf %114, %130 : vector<16x256xf32>
    %132 = vector.shape_cast %131 : vector<16x256xf32> to vector<1x16x256xf32>
    %c0_45 = arith.constant 0 : index
    %c0_46 = arith.constant 0 : index
    %c0_47 = arith.constant 0 : index
    %133 = vector.load %arg11[%c0_45, %c0_46, %c0_47] : memref<1x16x256xf32, #tpu.memory_space<vmem>>, vector<1x16x256xf32>
    tpu.vector_store %arg11[%c0_45, %c0_46, %c0_47], %132 {strides = array<i32>} : memref<1x16x256xf32, #tpu.memory_space<vmem>>, vector<1x16x256xf32>,
    return
  }
  func.func @transform_0(%arg0: i32, %arg1: memref<2xi32, #tpu.memory_space<smem>>) -> (i32, i32, i32) {
    %c0_i32 = arith.constant 0 : i32
    %c0_i32_0 = arith.constant 0 : i32
    %c0_i32_1 = arith.constant 0 : i32
    return %arg0, %c0_i32, %c0_i32_0 : i32, i32, i32
  }
  func.func @transform_1(%arg0: i32, %arg1: memref<2xi32, #tpu.memory_space<smem>>) -> (i32, i32) {
    %c0_i32 = arith.constant 0 : i32
    %c0_i32_0 = arith.constant 0 : i32
    %c0_i32_1 = arith.constant 0 : i32
    return %c0_i32, %c0_i32_0 : i32, i32
  }
  func.func @transform_2(%arg0: i32, %arg1: memref<2xi32, #tpu.memory_space<smem>>) -> (i32, i32) {
    %c0_i32 = arith.constant 0 : i32
    %c0_i32_0 = arith.constant 0 : i32
    %c0_i32_1 = arith.constant 0 : i32
    return %c0_i32, %c0_i32_0 : i32, i32
  }
  func.func @transform_3(%arg0: i32, %arg1: memref<2xi32, #tpu.memory_space<smem>>) -> (i32, i32) {
    %c0_i32 = arith.constant 0 : i32
    %c0_i32_0 = arith.constant 0 : i32
    %c0_i32_1 = arith.constant 0 : i32
    return %c0_i32, %c0_i32_0 : i32, i32
  }
  func.func @transform_4(%arg0: i32, %arg1: memref<2xi32, #tpu.memory_space<smem>>) -> (i32, i32) {
    %c0_i32 = arith.constant 0 : i32
    %c0_i32_0 = arith.constant 0 : i32
    %c0_i32_1 = arith.constant 0 : i32
    return %c0_i32, %c0_i32_0 : i32, i32
  }
  func.func @transform_5(%arg0: i32, %arg1: memref<2xi32, #tpu.memory_space<smem>>) -> (i32, i32) {
    %c0_i32 = arith.constant 0 : i32
    %c0_i32_0 = arith.constant 0 : i32
    %c0_i32_1 = arith.constant 0 : i32
    return %c0_i32, %c0_i32_0 : i32, i32
  }
  func.func @transform_6(%arg0: i32, %arg1: memref<2xi32, #tpu.memory_space<smem>>) -> (i32, i32) {
    %c0_i32 = arith.constant 0 : i32
    %c0_i32_0 = arith.constant 0 : i32
    %c0_i32_1 = arith.constant 0 : i32
    return %c0_i32, %c0_i32_0 : i32, i32
  }
  func.func @transform_7(%arg0: i32, %arg1: memref<2xi32, #tpu.memory_space<smem>>) -> (i32, i32) {
    %c0_i32 = arith.constant 0 : i32
    %c0_i32_0 = arith.constant 0 : i32
    %c0_i32_1 = arith.constant 0 : i32
    return %c0_i32, %c0_i32_0 : i32, i32
  }
  func.func @transform_8(%arg0: i32, %arg1: memref<2xi32, #tpu.memory_space<smem>>) -> (i32, i32) {
    %c0_i32 = arith.constant 0 : i32
    %c0_i32_0 = arith.constant 0 : i32
    %c0_i32_1 = arith.constant 0 : i32
    return %c0_i32, %c0_i32_0 : i32, i32
  }
  func.func @transform_9(%arg0: i32, %arg1: memref<2xi32, #tpu.memory_space<smem>>) -> (i32, i32, i32) {
    %c0_i32 = arith.constant 0 : i32
    %c0_i32_0 = arith.constant 0 : i32
    %c0_i32_1 = arith.constant 0 : i32
    return %arg0, %c0_i32, %c0_i32_0 : i32, i32, i32
  }
}

</mosaic_0001>

<bundles_post_ra>
// kernel: tpu_custom_call.1
= control target key start
LH: loop header
LB: loop body
LE: loop exit
PB: predicated region body
PF: predicated region fallthrough
CT: control target
= control target key end

     0   :  { %s2633_s0 = inlined_call_operand.hbm [shape: s32[2], index: 0, kind: input, shape index: {}]   ;;  %s2634_s1 = inlined_call_operand.hbm [shape: f32[2,16,32], index: 1, kind: input, shape index: {}]   ;;  %s2635_s2 = inlined_call_operand.hbm [shape: bf16[96,256], index: 2, kind: input, shape index: {}]   ;;  %s2636_s3 = inlined_call_operand.vmem [shape: f32[1,256], index: 3, kind: input, shape index: {}]   ;;  %s2637_s4 = inlined_call_operand.vmem [shape: f32[1,256], index: 4, kind: input, shape index: {}]   ;;  %s2638_s5 = inlined_call_operand.vmem [shape: f32[1,256], index: 5, kind: input, shape index: {}]   ;;  %s2639_s6 = inlined_call_operand.hbm [shape: bf16[768,256], index: 6, kind: input, shape index: {}]   ;;  %s2640_s7 = inlined_call_operand.vmem [shape: f32[1,256], index: 7, kind: input, shape index: {}]   ;;  %s2641_s8 = inlined_call_operand.vmem [shape: f32[1,256], index: 8, kind: input, shape index: {}]   ;;  %s2642_s9 = inlined_call_operand.vmem [shape: f32[1,256], index: 9, kind: input, shape index: {}]   ;;  %s2643_s10 = inlined_call_operand.hbm [shape: f32[2,16,256], index: 10, kind: output, shape index: {}]  }
   0x1   :  { %s2030_s15 = scalar_lea.hbm %s2633_s0, 16 }
   0x2   :  { %p2031_p0 = scmp.ne.s32.totalorder %s2633_s0, %s2030_s15  ;;  %p2034_p1 = scmp.lt.u32.totalorder %s2030_s15, %s2633_s0 }
   0x4   :  { %p2036_p2 = pnand %p2034_p1, %p2031_p0 }
   0x6   :  { %2039 = shalt.err (!%p2036_p2)  }
   0x7   :  { %s2200_s20 = smov [#allocation3]  }
   0x8   :  { %16 = dma.hbm_to_smem %s2633_s0, 16, %s2200_s20, [#allocation2] }
   0x9   :  { %2170 = dma.done.wait [#allocation2], 16 }
   0xa   :  { %2171 = vsyncadd [#allocation2], 4294967280 }
   0xb   :  { %18 = sfence }
   0xc   :  { %19 = vsyncpa [#allocation5], 0 }
   0xd   :  { %21 = vsyncpa [#allocation5 + $0x1], 0 }
   0xe   :  { %22 = vsyncpa [#allocation8], 0 }
   0xf   :  { %23 = vsyncpa [#allocation6], 0 }
  0x10   :  { %25 = vsyncpa [#allocation6 + $0x1], 0  ;;  %s2281_s23 = smov 0   ;;  %s2283_s24 = smov 0  }
  0x11   :  { %s2285_s25 = smov 0   ;;  %s2287_s26 = smov 0  }
  0x12 LB: > { %s2302_s0 = sadd.s32 4294967295, %s2198_s26   ;;  %s1632_s27 = sadd.s32 4294967294, %s2198_s26   ;;  %s2198_s26 = sphi %s2287_s26, %s2670_s26   ;;  %s2194_s25 = sphi %s2285_s25, %s2669_s25   ;;  %s2190_s24 = sphi %s2283_s24, %s2668_s24   ;;  %s2186_s23 = sphi %s2281_s23, %s2667_s23  }
  0x13   : > { %p51_p3 = scmp.ne.s32.totalorder %s2190_s24, %s2186_s23  ;;  %p2644_p4 = scmp.eq.s32.totalorder %s2302_s0, 0 }
  0x14   : > { %p249_p6 = scmp.eq.s32.totalorder %s1632_s27, 1  ;;  %p1633_p8 = scmp.ge.s32.totalorder %s2198_s26, 1 }
  0x15   : > { %p2311_p7 = por %p2644_p4, %p51_p3  ;;  %p256_p10 = scmp.lt.s32.totalorder %s2198_s26, 3 }
  0x16   : > { %p2316_p9 = por %p249_p6, %p51_p3  ;;  %s2201_s11 = smov [#allocation7]  }
  0x17   : > { %s2650_s28 = scalar_select %p2311_p7, 1, 0 }
  0x18   : > { %s2651_s29 = scalar_select %p2316_p9, 1, 0 }
  0x19   : > { %p2321_p11 = pnand %p1633_p8, %p256_p10  ;;  %s268_s12 = sshll.u32 %s2201_s11, 4  ;;  %s2325_s12 = int_to_ptr.vmem [resolvable:$true] %s268_s12 }
  0x1a   : > { %2652 = sst [smem:[#allocation15_spill]] %s2651_s29  ;;  %s2202_s14 = smov [#allocation9]  }
  0x1b   : > { %p1785_p12 = pneg %p2321_p11  ;;  %s290_s15 = sshll.u32 %s2202_s14, 4  ;;  %s2336_s15 = int_to_ptr.vmem [resolvable:$true] %s290_s15 }
  0x1c   : > { %s2040_s18 = scalar_lea.hbm %s2635_s2, 1536 }
  0x1d   : > { %p2332_p0 = pnand %p1785_p12, %p2644_p4  ;;  %p2041_p1 = scmp.ne.s32.totalorder %s2635_s2, %s2040_s18 }
  0x1e   : > { %p2047_p8 = scmp.lt.u32.totalorder %s2040_s18, %s2635_s2 }
  0x1f   : > { %p2042_p2 = pneg %p2332_p0 }
  0x21   : > { %p2043_p3 = pnand %p2042_p2, %p2041_p1 }
  0x23   : > { %p2044_p6 = pneg %p2043_p3 }
  0x25   : > { %p2049_p10 = pnand %p2047_p8, %p2044_p6 }
  0x27   : > { %2052 = shalt.err (!%p2049_p10)
}
  0x28   : > { %s2053_s27 = scalar_lea.vmem %s2325_s12, 1536  ;;  %p2061_p5 = scmp.lt.s32.totalorder %s2325_s12, %s2325_s12 }
  0x29   : > { %p2054_p12 = scmp.ne.s32.totalorder %s2325_s12, %s2053_s27  ;;  %p2062_p1 = scmp.lt.s32.totalorder %s2053_s27, %s2053_s27 }
  0x2b   : > { %p2056_p13 = pnand %p2054_p12, %p2042_p2  ;;  %p2063_p3 = por %p2062_p1, %p2061_p5 }
  0x2d   : > { %p2057_p4 = pneg %p2056_p13 }
  0x2f   : > { %p2064_p9 = pnand %p2063_p3, %p2057_p4 }
  0x31   : > { %2067 = shalt.err (!%p2064_p9)
}
  0x32   : > { %s2646_s11 = smov 128   ;;  %s2647_s14 = smov 8  }
  0x33   : > { %1788 = dma.hbm_to_vmem [thread:$0]  (!%p2332_p0), %s2635_s2, 1536, %s2325_s12, [#allocation8], %s2646_s11, %s2646_s11, %s2647_s14  }
  0x34   : > { %s2068_s20 = scalar_lea.hbm %s2639_s6, 12288 }
  0x35   : > { %p2069_p4 = scmp.ne.s32.totalorder %s2639_s6, %s2068_s20  ;;  %p2075_p13 = scmp.lt.u32.totalorder %s2068_s20, %s2639_s6 }
  0x37   : > { %p2071_p5 = pnand %p2069_p4, %p2042_p2 }
  0x39   : > { %p2072_p9 = pneg %p2071_p5 }
  0x3b   : > { %p2077_p6 = pnand %p2075_p13, %p2072_p9 }
  0x3d   : > { %2080 = shalt.err (!%p2077_p6)
}
  0x3e   : > { %s2081_s12 = scalar_lea.vmem %s2336_s15, 12288  ;;  %p2089_p1 = scmp.lt.s32.totalorder %s2336_s15, %s2336_s15 }
  0x3f   : > { %p2082_p8 = scmp.ne.s32.totalorder %s2336_s15, %s2081_s12  ;;  %p2090_p3 = scmp.lt.s32.totalorder %s2081_s12, %s2081_s12 }
  0x41   : > { %p2084_p10 = pnand %p2082_p8, %p2042_p2  ;;  %p2091_p4 = por %p2090_p3, %p2089_p1 }
  0x43   : > { %p2085_p12 = pneg %p2084_p10 }
  0x45   : > { %p2092_p5 = pnand %p2091_p4, %p2085_p12 }
  0x47   : > { %2095 = shalt.err (!%p2092_p5)
}
  0x48   : > { %1791 = dma.hbm_to_vmem [thread:$0]  (!%p2332_p0), %s2639_s6, 12288, %s2336_s15, [#allocation8], %s2646_s11, %s2646_s11, %s2647_s14  }
  0x49   : > { %s2397_s13 = sadd.s32 1, %s2198_s26   ;;  %s38_s17 = sadd.s32 1, %s2194_s25 }
  0x4a   : > { %s35_s18 = ssub.s32 %s2198_s26, %s2397_s13  ;;  %p45_p2 = scmp.ne.s32.totalorder %s2194_s25, %s2190_s24 }
  0x4b   : > { %p36_p9 = scmp.eq.s32.totalorder %s35_s18, 0  ;;  %p46_p13 = scmp.eq.s32.totalorder %s2198_s26, 0 }
  0x4c   : > { %p2655_p6 = scmp.eq.s32.totalorder %s2302_s0, 1  ;;  %p1802_p10 = scmp.lt.s32.totalorder %s2198_s26, 2 }
  0x4d   : > { %s2413_s20 = scalar_select %p36_p9, %s2194_s25, %s38_s17  }
  0x4e   : > { %p2407_p8 = por %p2655_p6, %p45_p2  ;;  %p47_p12 = por %p46_p13, %p45_p2 }
  0x4f   : > { %s313_s21 = sand.u32 1, %s2194_s25   ;;  %s1759_s15 = sshll.u32 %s2198_s26, 8 }
  0x50   : > { %s2656_s19 = scalar_select %p2407_p8, 1, 0 }
  0x51   : > { %s1637_s22 = sshll.u32 %s313_s21, 4  ;;  %s2420_s29 = scalar_lea.hbm %s2634_s1, %s1759_s15 }
  0x52   : > { %s317_s16 = scalar_lea.vmem [#allocation4], %s1637_s22  ;;  %p2424_p0 = pnand %p1802_p10, %p47_p12 }
  0x53   : > { %s324_s18 = sshll.u32 %s317_s16, 4  ;;  %s2428_s11 = scalar_lea.sflag [#allocation5], %s313_s21  ;;  %s2422_s18 = int_to_ptr.vmem [resolvable:$true] %s324_s18 }
  0x54   : > { %s2096_s14 = scalar_lea.hbm %s2420_s29, 256  ;;  %p2098_p3 = pneg %p2424_p0 }
  0x55   : > { %p2097_p1 = scmp.ne.s32.totalorder %s2420_s29, %s2096_s14  ;;  %s2101_s27 = scalar_lea.hbm %s2634_s1, 512 }
  0x56   : > { %p2102_p2 = scmp.lt.u32.totalorder %s2420_s29, %s2634_s1  ;;  %p2103_p9 = scmp.lt.u32.totalorder %s2101_s27, %s2096_s14 }
  0x57   : > { %p2099_p4 = pnand %p2098_p3, %p2097_p1  ;;  %p2105_p6 = scmp.lt.u32.totalorder %s2096_s14, %s2420_s29 }
  0x58   : > { %p2104_p13 = por %p2103_p9, %p2102_p2 }
  0x59   : > { %p2100_p5 = pneg %p2099_p4 }
  0x5a   : > { %p2106_p10 = por %p2105_p6, %p2104_p13 }
  0x5c   : > { %p2107_p12 = pnand %p2106_p10, %p2100_p5 }
  0x5e   : > { %2110 = shalt.err (!%p2107_p12)
}
  0x5f   : > { %s2111_s21 = scalar_lea.vmem %s2422_s18, 256  ;;  %s2205_s22 = smov [#allocation4]  }
  0x60   : > { %p2112_p1 = scmp.ne.s32.totalorder %s2422_s18, %s2111_s21  ;;  %s2116_s15 = sshll.u32 %s2205_s22, 4  ;;  %s2117_s15 = int_to_ptr.vmem [resolvable:$false] %s2116_s15 }
  0x61   : > { %s2118_s12 = scalar_lea.vmem %s2117_s15, 512  ;;  %p2119_p7 = scmp.lt.s32.totalorder %s2422_s18, %s2117_s15 }
  0x62   : > { %p2114_p4 = pnand %p2112_p1, %p2098_p3  ;;  %p2120_p2 = scmp.lt.s32.totalorder %s2118_s12, %s2111_s21 }
  0x64   : > { %p2115_p8 = pneg %p2114_p4  ;;  %p2121_p9 = por %p2120_p2, %p2119_p7 }
  0x66   : > { %p2122_p13 = pnand %p2121_p9, %p2115_p8 }
  0x68   : > { %2125 = shalt.err (!%p2122_p13)
}
  0x69   : > { %s2658_s14 = smov 8   ;;  %s2659_s27 = smov 128  }
  0x6a   : > { %1795 = dma.hbm_to_vmem [thread:$0]  (!%p2424_p0), %s2420_s29, 256, %s2422_s18, %s2428_s11, %s2659_s27, %s2659_s27, %s2658_s14  }
  0x6b   : > { %336 = sbr.rel (%p2321_p11) target bundleno = 1124 (0x464), region = 56  ;;  %s2462_s16 = sand.u32 (!%p2321_p11), 1, %s2190_s24  }
  0x6c   : > { %s1641_s21 = sshll.u32 (!%p2321_p11), %s2462_s16, 4  ;;  %s339_s22 = scalar_lea.sflag (!%p2321_p11), [#allocation5], %s2462_s16 }
  0x6d   : > { %s342_s15 = scalar_lea.vmem (!%p2321_p11), [#allocation4], %s1641_s21  ;;  %p2660_p7 = scmp.ne.s32.totalorder (!%p2321_p11), %s2650_s28, 0 }
  0x72   : > { %2173 = dma.done.wait (%p2660_p7), %s339_s22, 256  }
  0x73   : > { %2175 = vsyncadd (%p2660_p7), %s339_s22, 4294967040  ;;  %p2661_p8 = scmp.eq.s32.totalorder %s2302_s0, 0 }
  0x75   : > { %2177 = dma.done.wait (%p2661_p8), [#allocation8], 13824   ;;  %p2662_p0 = pmov %p2661_p8 }
  0x76   : > { %v388_v0 = vlaneseq  ;;  %vm427_vm0 = vcmask 1040384   ;;  %v386_v4 = vld [vmem:[%s342_s15] sm:$0xff]  ;;  %v387_v5 = vld [vmem:[%s342_s15 + $0x8] sm:$0xff]  ;;  %vm435_vm1 = vcmask 1046528   ;;  %v2206_v6 = vmov 0   ;;  %s2207_s28 = smov 32  }
  0x77   : > { %2179 = vsyncadd (%p2662_p0), [#allocation8], 4294953472  ;;  %586 = vmatprep.mubr.bf16.mxu0 %v2206_v6  ;;  %v424_v7 = vrot.slane %v387_v5, 7  ;;  %v437_v8 = vrot.slane %v387_v5, 1  ;;  %v1850_v9 = vpack.i.bf16 %v387_v5, %v386_v4  ;;  %v428_v10 = vrot.slane %v386_v4, 7  ;;  %s2209_s30 = smov 64  }
  0x78   : > { %v2474_v1 = vshrl.u32 %v388_v0, 7  ;;  %v1860_v11 = vld [vmem:[#allocation7 + $0x4] ss:$8 sps:$4 sm:$0xff]   ;;  %v436_v12 = vrot.slane %v386_v4, 1  ;;  %v1862_v13 = vld [vmem:[#allocation7] ss:$8 sps:$4 sm:$0xff]  }
  0x79   : > { %1851 = vrot.lane.b32.xlu0 %v1850_v9, %s2207_s28  ;;  %v432_v14 = vsel %vm427_vm0, %v424_v7, %v428_v10  ;;  %v2208_v15 = vmov 1.0   ;;  %554 = vmatprep.subr.bf16.mxu0 %v1860_v11  ;;  %v1863_v17 = vld [vmem:[#allocation7 + $0x14] ss:$8 sps:$4 sm:$0xff]   ;;  %v1865_v20 = vld [vmem:[#allocation7 + $0x10] ss:$8 sps:$4 sm:$0xff]   ;;  %v429_v21 = vsel %vm427_vm0, %v428_v10, %v424_v7  ;;  %vm459_vm4 = vcmask 261120  }
  0x7a   : > { %v2477_v2 = vadd.s32 8, %v2474_v1  ;;  %v438_v18 = vsel %vm435_vm1, %v436_v12, %v437_v8  ;;  %v442_v19 = vsel %vm435_vm1, %v437_v8, %v436_v12  ;;  %555 = vmatpush1.bf16.msra.mxu0 %v1862_v13  ;;  %v1866_v23 = vld [vmem:[#allocation7 + $0x24] ss:$8 sps:$4 sm:$0xff]   ;;  %v1868_v25 = vld [vmem:[#allocation7 + $0x20] ss:$8 sps:$4 sm:$0xff]   ;;  %v395_v32 = vand.u32 15, %v2474_v1 }
  0x7b   : > { %556 = vmatprep.subr.bf16.mxu0 %v1863_v17  ;;  %v1869_v26 = vld [vmem:[#allocation7 + $0x34] ss:$8 sps:$4 sm:$0xff]   ;;  %v1871_v27 = vld [vmem:[#allocation7 + $0x30] ss:$8 sps:$4 sm:$0xff]   ;;  %v1872_v28 = vld [vmem:[#allocation7 + $0x44] ss:$8 sps:$4 sm:$0xff]  }
  0x7c   : > { %v402_v3 = vand.u32 15, %v2477_v2  ;;  %v1874_v29 = vld [vmem:[#allocation7 + $0x40] ss:$8 sps:$4 sm:$0xff]   ;;  %v1875_v30 = vld [vmem:[#allocation7 + $0x54] ss:$8 sps:$4 sm:$0xff]   ;;  %vm415_vm3 = vcmp.eq.s32.totalorder %v395_v32, 0 }
  0x7d   : > { %v1877_v31 = vld [vmem:[#allocation7 + $0x50] ss:$8 sps:$4 sm:$0xff]   ;;  %v2492_v34 = vsel %vm415_vm3, 0.0, %v2208_v15  ;;  %vm462_vm5 = vcmask 523264   ;;  %vm550_vm6 = vcmask 785408   ;;  %s1504_s22 = sld [smem:[#allocation3 + %s2302_s0]] }
  0x7e   : > { %vm420_vm2 = vcmp.eq.s32.totalorder %v402_v3, 15  ;;  %557 = vmatpush1.bf16.msra.mxu0 %v1865_v20  ;;  %v433_v37 = vmul.f32 %v432_v14, %v2492_v34  ;;  %v1878_v46 = vld [vmem:[#allocation9 + $0x104] ss:$8 sps:$4 sm:$0xff]   ;;  %v1880_v47 = vld [vmem:[#allocation9 + $0x100] ss:$8 sps:$4 sm:$0xff]   ;;  %s1644_s29 = sshll.u32 %s2462_s16, 5 }
  0x7f   : > { %v2483_v16 = vsel %vm420_vm2, 0.0, %v2208_v15  ;;  %558 = vmatprep.subr.bf16.mxu0 %v1866_v23  ;;  %v1881_v48 = vld [vmem:[#allocation9 + $0x114] ss:$8 sps:$4 sm:$0xff]   ;;  %v1884_v49 = vld [vmem:[#allocation9] ss:$8 sps:$4 sm:$0xff]   ;;  %1346 = vmatprep.subr.bf16.mxu1 %v1878_v46  ;;  %v2496_v15 = vsub.s32 0, %v2474_v1 }
  0x80   : > { %v444_v22 = vmul.f32 %v442_v19, %v2483_v16  ;;  %v1886_v50 = vld [vmem:[#allocation9 + $0x4] ss:$8 sps:$4 sm:$0xff]   ;;  %1347 = vmatpush1.bf16.msra.mxu1 %v1880_v47  ;;  %v1883_v51 = vld [vmem:[#allocation9 + $0x110] ss:$8 sps:$4 sm:$0xff]   ;;  %v1892_v52 = vld [vmem:[#allocation9 + $0x14] ss:$8 sps:$4 sm:$0xff]  }
  0x81   : > { %1348 = vmatprep.subr.bf16.mxu1 %v1881_v48  ;;  %v1887_v53 = vld [vmem:[#allocation9 + $0x124] ss:$8 sps:$4 sm:$0xff]   ;;  %v1890_v54 = vld [vmem:[#allocation9 + $0x10] ss:$8 sps:$4 sm:$0xff]   ;;  %v1889_v56 = vld [vmem:[#allocation9 + $0x120] ss:$8 sps:$4 sm:$0xff]  }
  0x82   : > { %v1855_v24 = vpack.i.bf16 %v444_v22, %v438_v18  ;;  %559 = vmatpush1.bf16.msra.mxu0 %v1868_v25  ;;  %v1898_v55 = vld [vmem:[#allocation9 + $0x24] ss:$8 sps:$4 sm:$0xff]   ;;  %v1893_v57 = vld [vmem:[#allocation9 + $0x134] ss:$8 sps:$4 sm:$0xff]   ;;  %v1896_v58 = vld [vmem:[#allocation9 + $0x20] ss:$8 sps:$4 sm:$0xff]  }
  0x83   : > { %560 = vmatprep.subr.bf16.mxu0 %v1869_v26  ;;  %v1904_v59 = vld [vmem:[#allocation9 + $0x34] ss:$8 sps:$4 sm:$0xff]   ;;  %v1895_v60 = vld [vmem:[#allocation9 + $0x130] ss:$8 sps:$4 sm:$0xff]   ;;  %v1899_v61 = vld [vmem:[#allocation9 + $0x144] ss:$8 sps:$4 sm:$0xff]  }
  0x84   : > { %1856 = vrot.lane.b32.xlu0 %v1855_v24, %s2209_s30  ;;  %1349 = vmatpush1.bf16.msra.mxu1 %v1883_v51  ;;  %v1902_v62 = vld [vmem:[#allocation9 + $0x30] ss:$8 sps:$4 sm:$0xff]   ;;  %v1910_v63 = vld [vmem:[#allocation9 + $0x44] ss:$8 sps:$4 sm:$0xff]   ;;  %v1901_v0 = vld [vmem:[#allocation9 + $0x140] ss:$8 sps:$4 sm:$0xff]  }
  0x85   : > { %1350 = vmatprep.subr.bf16.mxu1 %v1887_v53  ;;  %v1905_v4 = vld [vmem:[#allocation9 + $0x154] ss:$8 sps:$4 sm:$0xff]   ;;  %v1908_v5 = vld [vmem:[#allocation9 + $0x40] ss:$8 sps:$4 sm:$0xff]   ;;  %v1907_v7 = vld [vmem:[#allocation9 + $0x150] ss:$8 sps:$4 sm:$0xff]  }
  0x86   : > { %561 = vmatpush1.bf16.msra.mxu0 %v1871_v27  ;;  %v1916_v6 = vld [vmem:[#allocation9 + $0x54] ss:$8 sps:$4 sm:$0xff]   ;;  %v1911_v8 = vld [vmem:[#allocation9 + $0x164] ss:$8 sps:$4 sm:$0xff]   ;;  %v1914_v9 = vld [vmem:[#allocation9 + $0x50] ss:$8 sps:$4 sm:$0xff]  }
  0x87   : > { %562 = vmatprep.subr.bf16.mxu0 %v1872_v28  ;;  %v1922_v10 = vld [vmem:[#allocation9 + $0x64] ss:$8 sps:$4 sm:$0xff]   ;;  %v1913_v11 = vld [vmem:[#allocation9 + $0x160] ss:$8 sps:$4 sm:$0xff]   ;;  %v1917_v12 = vld [vmem:[#allocation9 + $0x174] ss:$8 sps:$4 sm:$0xff]  }
  0x88   : > { %1351 = vmatpush1.bf16.msra.mxu1 %v1889_v56  ;;  %v1920_v13 = vld [vmem:[#allocation9 + $0x60] ss:$8 sps:$4 sm:$0xff]   ;;  %v1919_v14 = vld [vmem:[#allocation9 + $0x170] ss:$8 sps:$4 sm:$0xff]   ;;  %v2502_v18 = vsub.s32 1, %v2474_v1  ;;  %s1760_s18 = sshll.u32 %s2302_s0, 9 }
  0x89   : > { %1352 = vmatprep.subr.bf16.mxu1 %v1893_v57  ;;  %v478_v17 = vld [vmem:[%s2636_s3] sm:$0x3]  ;;  %v1929_v47 = vld [vmem:[#allocation9 + $0x194] ss:$8 sps:$4 sm:$0xff]   ;;  %v1935_v51 = vld [vmem:[#allocation9 + $0x1a4] ss:$8 sps:$4 sm:$0xff]   ;;  %s2587_s21 = scalar_lea.hbm %s2643_s10, %s1760_s18 }
  0x8a   : > { %563 = vmatpush1.bf16.msra.mxu0 %v1874_v29  ;;  %v483_v19 = vrot.slane %v478_v17, %v2496_v15  ;;  %v487_v20 = vrot.slane %v478_v17, %v2502_v18  ;;  %v1926_v46 = vld [vmem:[#allocation9 + $0x70] ss:$8 sps:$4 sm:$0xff]   ;;  %v1940_v53 = vld [vmem:[#allocation9 + $0x94] ss:$8 sps:$4 sm:$0xff]   ;;  %v1946_v57 = vld [vmem:[#allocation9 + $0xa4] ss:$8 sps:$4 sm:$0xff]  }
  0x8b   : > { %564 = vmatprep.subr.bf16.mxu0 %v1875_v30  ;;  %v1931_v48 = vld [vmem:[#allocation9 + $0x190] ss:$8 sps:$4 sm:$0xff]   ;;  %v1976_v17 = vld [vmem:[#allocation9 + $0xf4] ss:$8 sps:$4 sm:$0xff]   ;;  %s384_s17 = scalar_lea.vmem [#allocation10], %s1644_s29  ;;  %s1527_s0 = scalar_lea.sflag [#allocation6], %s2462_s16 }
  0x8c   : > { %1353 = vmatpush1.bf16.msra.mxu1 %v1895_v60  ;;  %v1943_v56 = vld [vmem:[#allocation9 + $0x1b0] ss:$8 sps:$4 sm:$0xff]   ;;  %v1949_v60 = vld [vmem:[#allocation9 + $0x1c0] ss:$8 sps:$4 sm:$0xff]   ;;  %s1540_s12 = sshll.u32 %s384_s17, 4  ;;  %p2663_p3 = scmp.ne.s32.totalorder %s2656_s19, 0  ;;  %s2589_s12 = int_to_ptr.vmem [resolvable:$true] %s1540_s12 }
  0x8d   : > { %1354 = vmatprep.subr.bf16.mxu1 %v1899_v61  ;;  %v1952_v61 = vld [vmem:[#allocation9 + $0xb4] ss:$8 sps:$4 sm:$0xff]   ;;  %s2211_s15 = smov [#allocation10]  }
  0x8e   : > { %565 = vmatpush1.bf16.msra.mxu0 %v1877_v31  ;;  %s2130_s28 = sshll.u32 %s2211_s15, 4  ;;  %s2131_s28 = int_to_ptr.vmem [resolvable:$false] %s2130_s28 }
  0x8f   : > { %1303 = vmatprep.subr.bf16.mxu0 %v1886_v50  ;;  %v1932_v50 = vld [vmem:[#allocation9 + $0x80] ss:$8 sps:$4 sm:$0xff]   ;;  %s2132_s30 = scalar_lea.vmem %s2131_s28, 1024  ;;  %p2133_p10 = scmp.lt.s32.totalorder %s2589_s12, %s2131_s28 }
  0x90   : > { %1355 = vmatpush1.bf16.msra.mxu1 %v1901_v0  ;;  %v1958_v0 = vld [vmem:[#allocation9 + $0xc4] ss:$8 sps:$4 sm:$0xff]  }
  0x91   : > { %1356 = vmatprep.subr.bf16.mxu1 %v1905_v4  ;;  %v1955_v4 = vld [vmem:[#allocation9 + $0x1d0] ss:$8 sps:$4 sm:$0xff]  }
  0x94   : > { %1357 = vmatpush1.bf16.msra.mxu1 %v1907_v7  ;;  %v1964_v7 = vld [vmem:[#allocation9 + $0xd4] ss:$8 sps:$4 sm:$0xff]  }
  0x95   : > { %1358 = vmatprep.subr.bf16.mxu1 %v1911_v8  ;;  %v1961_v8 = vld [vmem:[#allocation9 + $0x1e0] ss:$8 sps:$4 sm:$0xff]  }
  0x98   : > { %1359 = vmatpush1.bf16.msra.mxu1 %v1913_v11  ;;  %v1970_v11 = vld [vmem:[#allocation9 + $0xe4] ss:$8 sps:$4 sm:$0xff]  }
  0x99   : > { %1360 = vmatprep.subr.bf16.mxu1 %v1917_v12  ;;  %v1967_v12 = vld [vmem:[#allocation9 + $0x1f0] ss:$8 sps:$4 sm:$0xff]  }
  0x9c   : > { %1361 = vmatpush1.bf16.msra.mxu1 %v1919_v14  ;;  %v1973_v14 = vld [vmem:[#allocation9 + $0x204] ss:$8 sps:$4 sm:$0xff]  }
  0xeb   : > { %v1852_v33 = vpop.permute.xlu0 %1851 }
  0xec   : > { %v1854_v35 = vunpack.i.h.bf16 %v1852_v33  ;;  %v1853_v36 = vunpack.i.l.bf16 %v1852_v33 }
  0xee   : > { %v460_v41 = vsel %vm459_vm4, %v433_v37, %v1853_v36  ;;  %v461_v42 = vsel %vm459_vm4, %v429_v21, %v1854_v35 }
  0xf6   : > { %v1857_v38 = vpop.permute.xlu0 %1856 }
  0xf7   : > { %v1859_v39 = vunpack.i.h.bf16 %v1857_v38  ;;  %v1858_v40 = vunpack.i.l.bf16 %v1857_v38 }
  0xf9   : > { %v463_v43 = vsel %vm462_vm5, %v460_v41, %v1858_v40  ;;  %v464_v44 = vsel %vm462_vm5, %v461_v42, %v1859_v39 }
  0xfa   : > { %v465_v45 = vpack.c.bf16 %v464_v44, %v463_v43  ;;  %v1923_v43 = vld [vmem:[#allocation9 + $0x184] ss:$8 sps:$4 sm:$0xff]   ;;  %v1925_v44 = vld [vmem:[#allocation9 + $0x180] ss:$8 sps:$4 sm:$0xff]  }
  0xfb   : > { %1362 = vmatprep.subr.bf16.mxu1 %v1923_v43 }
  0xfc   : > { %1657 = vmatmul.mubr.msk.bf16.vlgmr.msra.gmra.mrb[0].mxu0 %vm550_vm6, %v465_v45  ;;  %v1928_v45 = vld [vmem:[#allocation9 + $0x74] ss:$8 sps:$4 sm:$0xff]   ;;  %1363 = vmatpush1.bf16.msra.mxu1 %v1925_v44 }
  0xfd   : > { %1304 = vmatpush1.bf16.msra.mxu0 %v1884_v49  ;;  %1364 = vmatprep.subr.bf16.mxu1 %v1929_v47  ;;  %v1934_v49 = vld [vmem:[#allocation9 + $0x84] ss:$8 sps:$4 sm:$0xff]  }
  0xfe   : > { %1305 = vmatprep.subr.bf16.mxu0 %v1892_v52  ;;  %v1937_v52 = vld [vmem:[#allocation9 + $0x1a0] ss:$8 sps:$4 sm:$0xff]  }
 0x100   : > { %1365 = vmatpush1.bf16.msra.mxu1 %v1931_v48 }
 0x101   : > { %1306 = vmatpush1.bf16.msra.mxu0 %v1890_v54  ;;  %1366 = vmatprep.subr.bf16.mxu1 %v1935_v51  ;;  %v1938_v54 = vld [vmem:[#allocation9 + $0x90] ss:$8 sps:$4 sm:$0xff]  }
 0x102   : > { %1307 = vmatprep.subr.bf16.mxu0 %v1898_v55  ;;  %v1941_v55 = vld [vmem:[#allocation9 + $0x1b4] ss:$8 sps:$4 sm:$0xff]  }
 0x104   : > { %1367 = vmatpush1.bf16.msra.mxu1 %v1937_v52 }
 0x105   : > { %1308 = vmatpush1.bf16.msra.mxu0 %v1896_v58  ;;  %1368 = vmatprep.subr.bf16.mxu1 %v1941_v55  ;;  %v1944_v58 = vld [vmem:[#allocation9 + $0xa0] ss:$8 sps:$4 sm:$0xff]  }
 0x106   : > { %1309 = vmatprep.subr.bf16.mxu0 %v1904_v59  ;;  %v1947_v59 = vld [vmem:[#allocation9 + $0x1c4] ss:$8 sps:$4 sm:$0xff]  }
 0x108   : > { %1369 = vmatpush1.bf16.msra.mxu1 %v1943_v56 }
 0x109   : > { %1310 = vmatpush1.bf16.msra.mxu0 %v1902_v62  ;;  %v1953_v62 = vld [vmem:[#allocation9 + $0x1d4] ss:$8 sps:$4 sm:$0xff]   ;;  %1370 = vmatprep.subr.bf16.mxu1 %v1947_v59 }
 0x10a   : > { %1311 = vmatprep.subr.bf16.mxu0 %v1910_v63  ;;  %v1950_v63 = vld [vmem:[#allocation9 + $0xb0] ss:$8 sps:$4 sm:$0xff]  }
 0x10c   : > { %1371 = vmatpush1.bf16.msra.mxu1 %v1949_v60 }
 0x10d   : > { %1312 = vmatpush1.bf16.msra.mxu0 %v1908_v5  ;;  %1372 = vmatprep.subr.bf16.mxu1 %v1953_v62  ;;  %v1959_v5 = vld [vmem:[#allocation9 + $0x1e4] ss:$8 sps:$4 sm:$0xff]  }
 0x10e   : > { %1313 = vmatprep.subr.bf16.mxu0 %v1916_v6  ;;  %v1956_v6 = vld [vmem:[#allocation9 + $0xc0] ss:$8 sps:$4 sm:$0xff]  }
 0x110   : > { %1373 = vmatpush1.bf16.msra.mxu1 %v1955_v4 }
 0x111   : > { %1314 = vmatpush1.bf16.msra.mxu0 %v1914_v9  ;;  %1374 = vmatprep.subr.bf16.mxu1 %v1959_v5  ;;  %v1965_v9 = vld [vmem:[#allocation9 + $0x1f4] ss:$8 sps:$4 sm:$0xff]  }
 0x112   : > { %1315 = vmatprep.subr.bf16.mxu0 %v1922_v10  ;;  %v1962_v10 = vld [vmem:[#allocation9 + $0xd0] ss:$8 sps:$4 sm:$0xff]  }
 0x114   : > { %1375 = vmatpush1.bf16.msra.mxu1 %v1961_v8 }
 0x115   : > { %1316 = vmatpush1.bf16.msra.mxu0 %v1920_v13  ;;  %1376 = vmatprep.subr.bf16.mxu1 %v1965_v9  ;;  %v1968_v13 = vld [vmem:[#allocation9 + $0xe0] ss:$8 sps:$4 sm:$0xff]  }
 0x116   : > { %1317 = vmatprep.subr.bf16.mxu0 %v1928_v45  ;;  %v602_v45 = vld [vmem:[%s2638_s5] sm:$0x3] }
 0x118   : > { %1377 = vmatpush1.bf16.msra.mxu1 %v1967_v12 }
 0x119   : > { %1318 = vmatpush1.bf16.msra.mxu0 %v1926_v46  ;;  %1389 = vmatprep.subr.bf16.mxu1 %v1973_v14  ;;  %v1977_v14 = vld [vmem:[#allocation9 + $0x210] ss:$8 sps:$4 sm:$0xff]  }
 0x11a   : > { %1319 = vmatprep.subr.bf16.mxu0 %v1934_v49 }
 0x11d   : > { %1320 = vmatpush1.bf16.msra.mxu0 %v1932_v50  ;;  %v662_v50 = vrot.slane %v602_v45, %v2502_v18 }
 0x11e   : > { %1321 = vmatprep.subr.bf16.mxu0 %v1940_v53 }
 0x121   : > { %1322 = vmatpush1.bf16.msra.mxu0 %v1938_v54 }
 0x122   : > { %1323 = vmatprep.subr.bf16.mxu0 %v1946_v57 }
 0x125   : > { %1324 = vmatpush1.bf16.msra.mxu0 %v1944_v58 }
 0x126   : > { %1325 = vmatprep.subr.bf16.mxu0 %v1952_v61 }
 0x129   : > { %1326 = vmatpush1.bf16.msra.mxu0 %v1950_v63 }
 0x12a   : > { %1327 = vmatprep.subr.bf16.mxu0 %v1958_v0 }
 0x12d   : > { %1328 = vmatpush1.bf16.msra.mxu0 %v1956_v6  ;;  %v1979_v6 = vld [vmem:[#allocation9 + $0x214] ss:$8 sps:$4 sm:$0xff]  }
 0x12e   : > { %1329 = vmatprep.subr.bf16.mxu0 %v1964_v7 }
 0x131   : > { %1330 = vmatpush1.bf16.msra.mxu0 %v1962_v10 }
 0x132   : > { %1331 = vmatprep.subr.bf16.mxu0 %v1970_v11 }
 0x135   : > { %1332 = vmatpush1.bf16.msra.mxu0 %v1968_v13 }
 0x136   : > { %1333 = vmatprep.subr.bf16.mxu0 %v1976_v17 }
 0x1cf   : > { %v588_v21 = vpop.f32.mrb[0].mxu0 }
 0x1d0   : > { %v589_v22 = vadd.f32 %v588_v21, %v483_v19  ;;  %v590_v23 = vpop.f32.mrb[1].mxu0 }
 0x1d1   : > { %v591_v24 = vadd.f32 %v590_v23, %v487_v20  ;;  %v592_v25 = vpop.f32.mrb[2].mxu0 }
 0x1d2   : > { %v2506_v26 = vmax.f32 %v589_v22, 0.0  ;;  %v593_v27 = vadd.f32 %v592_v25, %v483_v19  ;;  %v594_v28 = vpop.f32.mrb[3].mxu0  ;;  %v1974_v19 = vld [vmem:[#allocation9 + $0xf0] ss:$8 sps:$4 sm:$0xff]  }
 0x1d3   : > { %v2508_v29 = vmax.f32 %v591_v24, 0.0  ;;  %v595_v30 = vadd.f32 %v594_v28, %v487_v20  ;;  %1334 = vmatpush1.bf16.msra.mxu0 %v1974_v19 }
 0x1d4   : > { %v609_v31 = vmul.f32 %v2506_v26, %v2506_v26  ;;  %v2512_v33 = vmax.f32 %v593_v27, 0.0 }
 0x1d5   : > { %v2514_v35 = vmax.f32 %v595_v30, 0.0  ;;  %v603_v36 = vadd.f32 %v2508_v29, %v2506_v26  ;;  %v610_v37 = vmul.f32 %v2508_v29, %v2508_v29 }
 0x1d6   : > { %v611_v40 = vmul.f32 %v2512_v33, %v2512_v33 }
 0x1d7   : > { %604 = vadd.xlane.f32.xlu1 %v603_v36  ;;  %v613_v38 = vadd.f32 %v610_v37, %v609_v31  ;;  %v606_v39 = vadd.f32 %v2514_v35, %v2512_v33  ;;  %v612_v41 = vmul.f32 %v2514_v35, %v2514_v35 }
 0x1d9   : > { %614 = vadd.xlane.f32.xlu0 %v613_v38  ;;  %v616_v42 = vadd.f32 %v612_v41, %v611_v40  ;;  %v601_v40 = vld [vmem:[%s2637_s4] sm:$0x3] }
 0x1da   : > { %v647_v44 = vrot.slane %v601_v40, %v2502_v18  ;;  %v643_v47 = vrot.slane %v601_v40, %v2496_v15  ;;  %v1997_v40 = vld [vmem:[#allocation9 + $0x274] ss:$8 sps:$4 sm:$0xff]  }
 0x1db   : > { %607 = vadd.xlane.f32.xlu1 %v606_v39 }
 0x1df   : > { %617 = vadd.xlane.f32.xlu1 %v616_v42 }
 0x264   : > { %v605_v20 = vpop.xlane.xlu1 %604 }
 0x265   : > { %v619_v21 = vmul.f32 0.00390625, %v605_v20 }
 0x266   : > { %v615_v22 = vpop.xlane.xlu0 %614 }
 0x267   : > { %v621_v23 = vmul.f32 0.00390625, %v615_v22  ;;  %v623_v24 = vmul.f32 %v619_v21, %v619_v21  ;;  %v628_v41 = vsub.f32 %v2508_v29, %v619_v21  ;;  %v627_v43 = vsub.f32 %v2506_v26, %v619_v21 }
 0x268   : > { %v608_v25 = vpop.xlane.xlu1 %607  ;;  %v658_v26 = vrot.slane %v602_v45, %v2496_v15  ;;  %v2001_v45 = vld [vmem:[#allocation9 + $0x290] ss:$8 sps:$4 sm:$0xff]  }
 0x269   : > { %v625_v27 = vsub.f32 %v621_v23, %v623_v24  ;;  %v620_v28 = vmul.f32 0.00390625, %v608_v25  ;;  %v1982_v24 = vld [vmem:[#allocation9 + $0x224] ss:$8 sps:$4 sm:$0xff]  }
 0x26b   : > { %v631_v30 = vadd.f32 1e-05, %v625_v27  ;;  %v624_v36 = vmul.f32 %v620_v28, %v620_v28  ;;  %v629_v51 = vsub.f32 %v2512_v33, %v620_v28  ;;  %v630_v29 = vsub.f32 %v2514_v35, %v620_v28  ;;  %v1971_v35 = vld [vmem:[#allocation9 + $0x200] ss:$8 sps:$4 sm:$0xff]   ;;  %v1985_v28 = vld [vmem:[#allocation9 + $0x234] ss:$8 sps:$4 sm:$0xff]  }
 0x26c   : > { %v618_v31 = vpop.xlane.xlu1 %617  ;;  %v1980_v27 = vld [vmem:[#allocation9 + $0x220] ss:$8 sps:$4 sm:$0xff]  }
 0x26d   : > { %2022 = vrsqrt.f32 %v631_v30  ;;  %v622_v37 = vmul.f32 0.00390625, %v618_v31  ;;  %v1983_v30 = vld [vmem:[#allocation9 + $0x230] ss:$8 sps:$4 sm:$0xff]   ;;  %v1988_v31 = vld [vmem:[#allocation9 + $0x244] ss:$8 sps:$4 sm:$0xff]  }
 0x26f   : > { %v626_v38 = vsub.f32 %v622_v37, %v624_v36  ;;  %v1991_v36 = vld [vmem:[#allocation9 + $0x254] ss:$8 sps:$4 sm:$0xff]   ;;  %v1989_v37 = vld [vmem:[#allocation9 + $0x250] ss:$8 sps:$4 sm:$0xff]  }
 0x271   : > { %v632_v39 = vadd.f32 1e-05, %v626_v38  ;;  %v1994_v38 = vld [vmem:[#allocation9 + $0x264] ss:$8 sps:$4 sm:$0xff]  }
 0x273   : > { %2024 = vrsqrt.f32 %v632_v39  ;;  %v1992_v39 = vld [vmem:[#allocation9 + $0x260] ss:$8 sps:$4 sm:$0xff]  }
 0x277   : > { %v2023_v42 = vpop.eup %2022 }
 0x278   : > { %v636_v46 = vmul.f32 %v2023_v42, %v628_v41  ;;  %v635_v48 = vmul.f32 %v2023_v42, %v627_v43  ;;  %v1995_v41 = vld [vmem:[#allocation9 + $0x270] ss:$8 sps:$4 sm:$0xff]   ;;  %v2000_v42 = vld [vmem:[#allocation9 + $0x284] ss:$8 sps:$4 sm:$0xff]   ;;  %v1998_v43 = vld [vmem:[#allocation9 + $0x280] ss:$8 sps:$4 sm:$0xff]  }
 0x27a   : > { %v651_v49 = vmul.f32 %v647_v44, %v636_v46  ;;  %v650_v53 = vmul.f32 %v643_v47, %v635_v48  ;;  %v2006_v46 = vld [vmem:[#allocation9 + $0x2a4] ss:$8 sps:$4 sm:$0xff]   ;;  %v2009_v48 = vld [vmem:[#allocation9 + $0x2b4] ss:$8 sps:$4 sm:$0xff]  }
 0x27c   : > { %v666_v56 = vadd.f32 %v662_v50, %v651_v49  ;;  %v2540_v59 = vadd.f32 %v658_v26, %v650_v53  ;;  %v2007_v49 = vld [vmem:[#allocation9 + $0x2b0] ss:$8 sps:$4 sm:$0xff]  }
 0x27d   : > { %v2025_v52 = vpop.eup %2024 }
 0x27e   : > { %v638_v54 = vmul.f32 %v2025_v52, %v630_v29  ;;  %v637_v55 = vmul.f32 %v2025_v52, %v629_v51  ;;  %v678_v62 = vrot.slane %v666_v56, 7  ;;  %v694_v63 = vrot.slane %v666_v56, 1  ;;  %v2010_v51 = vld [vmem:[#allocation9 + $0x2c0] ss:$8 sps:$4 sm:$0xff]   ;;  %v2015_v29 = vld [vmem:[#allocation9 + $0x2d4] ss:$8 sps:$4 sm:$0xff]  }
 0x27f   : > { %v677_v8 = vrot.slane %v2540_v59, 7  ;;  %v2013_v52 = vld [vmem:[#allocation9 + $0x2d0] ss:$8 sps:$4 sm:$0xff]  }
 0x280   : > { %v653_v57 = vmul.f32 %v647_v44, %v638_v54  ;;  %v652_v58 = vmul.f32 %v643_v47, %v637_v55  ;;  %v2003_v44 = vld [vmem:[#allocation9 + $0x294] ss:$8 sps:$4 sm:$0xff]   ;;  %v2004_v47 = vld [vmem:[#allocation9 + $0x2a0] ss:$8 sps:$4 sm:$0xff]   ;;  %v691_v55 = vrot.slane %v2540_v59, 1 }
 0x281   : > { %v2016_v54 = vld [vmem:[#allocation9 + $0x2e0] ss:$8 sps:$4 sm:$0xff]  }
 0x282   : > { %v668_v60 = vadd.f32 %v662_v50, %v653_v57  ;;  %v2542_v61 = vadd.f32 %v658_v26, %v652_v58  ;;  %v2012_v50 = vld [vmem:[#allocation9 + $0x2c4] ss:$8 sps:$4 sm:$0xff]   ;;  %v2019_v58 = vld [vmem:[#allocation9 + $0x2f0] ss:$8 sps:$4 sm:$0xff]  }
 0x283   : > { %v2018_v26 = vld [vmem:[#allocation9 + $0x2e4] ss:$8 sps:$4 sm:$0xff]  }
 0x284   : > { %v672_v0 = vrot.slane %v668_v60, 7  ;;  %v695_v33 = vrot.slane %v668_v60, 1  ;;  %v712_v4 = vpack.c.bf16 %v668_v60, %v666_v56  ;;  %v711_v5 = vpack.c.bf16 %v2542_v61, %v2540_v59  ;;  %v2021_v56 = vld [vmem:[#allocation9 + $0x2f4] ss:$8 sps:$4 sm:$0xff]   ;;  %v811_v59 = vld [vmem:[%s2640_s7] sm:$0x3] }
 0x285   : > { %v671_v7 = vrot.slane %v2542_v61, 7  ;;  %v692_v53 = vrot.slane %v2542_v61, 1 }
 0x286   : > { %1378 = vmatprep.mubr.bf16.mxu1 %v712_v4  ;;  %v686_v9 = vsel %vm427_vm0, %v672_v0, %v678_v62  ;;  %v704_v10 = vsel %vm435_vm1, %v695_v33, %v694_v63  ;;  %v680_v17 = vsel %vm427_vm0, %v678_v62, %v672_v0  ;;  %v696_v19 = vsel %vm435_vm1, %v694_v63, %v695_v33 }
 0x287   : > { %1379 = vmatmul.mubr.bf16.vlgmr.msra.gmra.mrb[0].mxu1 %v711_v5  ;;  %v688_v11 = vmul.f32 %v686_v9, %v2492_v34  ;;  %v708_v12 = vmul.f32 %v704_v10, %v2483_v16  ;;  %v685_v13 = vsel %vm427_vm0, %v671_v7, %v677_v8  ;;  %v679_v23 = vsel %vm427_vm0, %v677_v8, %v671_v7 }
 0x288   : > { %1390 = vmatpush1.bf16.msra.mxu1 %v1971_v35  ;;  %v687_v20 = vmul.f32 %v685_v13, %v2492_v34  ;;  %v1986_v34 = vld [vmem:[#allocation9 + $0x240] ss:$8 sps:$4 sm:$0xff]   ;;  %v703_v57 = vsel %vm435_vm1, %v692_v53, %v691_v55  ;;  %v693_v62 = vsel %vm435_vm1, %v691_v55, %v692_v53  ;;  %v816_v35 = vrot.slane %v811_v59, %v2496_v15 }
 0x289   : > { %1391 = vmatprep.subr.bf16.mxu1 %v1979_v6  ;;  %v710_v21 = vpack.c.bf16 %v680_v17, %v688_v11  ;;  %v714_v22 = vpack.c.bf16 %v708_v12, %v696_v19  ;;  %v707_v60 = vmul.f32 %v703_v57, %v2483_v16  ;;  %v820_v5 = vrot.slane %v811_v59, %v2502_v18 }
 0x28a   : > { %v709_v25 = vpack.c.bf16 %v679_v23, %v687_v20  ;;  %v2210_v59 = vmov 0.0  }
 0x28b   : > { %1335 = vmatprep.mubr.bf16.mxu0 %v710_v21  ;;  %1421 = vmatprep.mubr.bf16.mxu1 %v714_v22  ;;  %v713_v63 = vpack.c.bf16 %v707_v60, %v693_v62 }
 0x28c   : > { %1392 = vmatpush1.bf16.msra.mxu1 %v1977_v14  ;;  %1336 = vmatmul.mubr.bf16.vlgmr.msra.gmra.mrb[4].mxu0 %v709_v25 }
 0x28d   : > { %1393 = vmatprep.subr.bf16.mxu1 %v1982_v24 }
 0x290   : > { %1394 = vmatpush1.bf16.msra.mxu1 %v1980_v27 }
 0x291   : > { %1395 = vmatprep.subr.bf16.mxu1 %v1985_v28 }
 0x294   : > { %1396 = vmatpush1.bf16.msra.mxu1 %v1983_v30 }
 0x295   : > { %1397 = vmatprep.subr.bf16.mxu1 %v1988_v31 }
 0x298   : > { %1398 = vmatpush1.bf16.msra.mxu1 %v1986_v34 }
 0x299   : > { %1399 = vmatprep.subr.bf16.mxu1 %v1991_v36 }
 0x29c   : > { %1400 = vmatpush1.bf16.msra.mxu1 %v1989_v37 }
 0x29d   : > { %1401 = vmatprep.subr.bf16.mxu1 %v1994_v38 }
 0x2a0   : > { %1402 = vmatpush1.bf16.msra.mxu1 %v1992_v39 }
 0x2a1   : > { %1403 = vmatprep.subr.bf16.mxu1 %v1997_v40 }
 0x2a4   : > { %1404 = vmatpush1.bf16.msra.mxu1 %v1995_v41 }
 0x2a5   : > { %1405 = vmatprep.subr.bf16.mxu1 %v2000_v42 }
 0x2a8   : > { %1406 = vmatpush1.bf16.msra.mxu1 %v1998_v43 }
 0x2a9   : > { %1407 = vmatprep.subr.bf16.mxu1 %v2003_v44 }
 0x2ac   : > { %1408 = vmatpush1.bf16.msra.mxu1 %v2001_v45 }
 0x2ad   : > { %1409 = vmatprep.subr.bf16.mxu1 %v2006_v46 }
 0x2b0   : > { %1410 = vmatpush1.bf16.msra.mxu1 %v2004_v47 }
 0x2b1   : > { %1411 = vmatprep.subr.bf16.mxu1 %v2009_v48 }
 0x2b4   : > { %1412 = vmatpush1.bf16.msra.mxu1 %v2007_v49 }
 0x2b5   : > { %1413 = vmatprep.subr.bf16.mxu1 %v2012_v50 }
 0x2b8   : > { %1414 = vmatpush1.bf16.msra.mxu1 %v2010_v51  ;;  %v1436_v51 = vld [vmem:[%s2641_s8] sm:$0x3] }
 0x2b9   : > { %1415 = vmatprep.subr.bf16.mxu1 %v2015_v29  ;;  %v1511_v29 = vstv %s1504_s22  ;;  %v1482_v55 = vrot.slane %v1436_v51, %v2502_v18  ;;  %s2126_s22 = scalar_lea.vmem %s2589_s12, 512 }
 0x2ba   : > { %vm1512_vm7 = vcmp.lt.s32.totalorder %v395_v32, %v1511_v29  ;;  %vm1513_vm8 = vcmp.lt.s32.totalorder %v402_v3, %v1511_v29  ;;  %p2127_p11 = scmp.ne.s32.totalorder %s2589_s12, %s2126_s22  ;;  %p2134_p12 = scmp.lt.s32.totalorder %s2132_s30, %s2126_s22 }
 0x2bc   : > { %1416 = vmatpush1.bf16.msra.mxu1 %v2013_v52  ;;  %v1437_v52 = vld [vmem:[%s2642_s9] sm:$0x3]  ;;  %p2128_p5 = pnand %p2127_p11, %p2663_p3  ;;  %p2135_p1 = por %p2134_p12, %p2133_p10 }
 0x2bd   : > { %1417 = vmatprep.subr.bf16.mxu1 %v2018_v26  ;;  %v1493_v57 = vrot.slane %v1437_v52, %v2496_v15 }
 0x2be   : > { %p2129_p6 = pneg %p2128_p5 }
 0x2c0   : > { %1418 = vmatpush1.bf16.msra.mxu1 %v2016_v54  ;;  %v1478_v54 = vrot.slane %v1436_v51, %v2496_v15  ;;  %p2136_p4 = pnand %p2135_p1, %p2129_p6 }
 0x2c1   : > { %1419 = vmatprep.subr.bf16.mxu1 %v2021_v56 }
 0x2c4   : > { %1420 = vmatpush1.bf16.msra.mxu1 %v2019_v58  ;;  %v1497_v58 = vrot.slane %v1437_v52, %v2502_v18 }
 0x2c7   : > { %1422 = vmatmul.mubr.bf16.vlgmr.msra.gmra.mrb[0].mxu1 %v713_v63 }
 0x35f   : > { %v1337_v0 = vpop.f32.mrb[4].mxu0 }
 0x360   : > { %v1339_v61 = vpop.f32.mrb[5].mxu0  ;;  %v1338_v6 = vadd.f32 %v1337_v0, %v816_v35 }
 0x361   : > { %v1341_v33 = vpop.f32.mrb[6].mxu0  ;;  %v1340_v7 = vadd.f32 %v1339_v61, %v820_v5 }
 0x362   : > { %v1343_v4 = vpop.f32.mrb[7].mxu0  ;;  %v1342_v8 = vadd.f32 %v1341_v33, %v816_v35  ;;  %v1516_v35 = vsel %vm1512_vm7, 1.0, %v2210_v59 }
 0x363   : > { %v1344_v11 = vadd.f32 %v1343_v4, %v820_v5 }
 0x39a   : > { %v1423_v16 = vpop.f32.mrb[0].mxu1 }
 0x39b   : > { %v1762_v9 = vadd.f32 %v1423_v16, %v1338_v6  ;;  %v1425_v10 = vpop.f32.mrb[1].mxu1 }
 0x39c   : > { %v1764_v12 = vadd.f32 %v1425_v10, %v1340_v7  ;;  %v1427_v13 = vpop.f32.mrb[2].mxu1 }
 0x39d   : > { %v1432_v14 = vmax.f32 %v1762_v9, 0.0  ;;  %v1766_v17 = vadd.f32 %v1427_v13, %v1342_v8  ;;  %v1429_v19 = vpop.f32.mrb[3].mxu1  ;;  %v1517_v8 = vsel %vm1513_vm8, 1.0, %v2210_v59 }
 0x39e   : > { %v1433_v20 = vmax.f32 %v1764_v12, 0.0  ;;  %v1768_v21 = vadd.f32 %v1429_v19, %v1344_v11 }
 0x39f   : > { %v1434_v22 = vmax.f32 %v1766_v17, 0.0  ;;  %v1444_v27 = vmul.f32 %v1432_v14, %v1432_v14 }
 0x3a0   : > { %v1435_v23 = vmax.f32 %v1768_v21, 0.0  ;;  %v1438_v24 = vadd.f32 %v1433_v20, %v1432_v14  ;;  %v1445_v28 = vmul.f32 %v1433_v20, %v1433_v20 }
 0x3a1   : > { %v1446_v31 = vmul.f32 %v1434_v22, %v1434_v22 }
 0x3a2   : > { %1439 = vadd.xlane.f32.xlu1 %v1438_v24  ;;  %v1441_v25 = vadd.f32 %v1435_v23, %v1434_v22  ;;  %v1448_v30 = vadd.f32 %v1445_v28, %v1444_v27  ;;  %v1447_v34 = vmul.f32 %v1435_v23, %v1435_v23 }
 0x3a4   : > { %v1451_v36 = vadd.f32 %v1447_v34, %v1446_v31 }
 0x3a6   : > { %1442 = vadd.xlane.f32.xlu1 %v1441_v25 }
 0x3aa   : > { %1449 = vadd.xlane.f32.xlu1 %v1448_v30 }
 0x3ae   : > { %1452 = vadd.xlane.f32.xlu1 %v1451_v36 }
 0x42f   : > { %v1440_v37 = vpop.xlane.xlu1 %1439 }
 0x430   : > { %v1454_v39 = vmul.f32 0.00390625, %v1440_v37 }
 0x432   : > { %v1458_v42 = vmul.f32 %v1454_v39, %v1454_v39  ;;  %v1462_v26 = vsub.f32 %v1432_v14, %v1454_v39  ;;  %v1463_v53 = vsub.f32 %v1433_v20, %v1454_v39 }
 0x433   : > { %v1443_v38 = vpop.xlane.xlu1 %1442 }
 0x434   : > { %v1455_v41 = vmul.f32 0.00390625, %v1443_v38 }
 0x436   : > { %v1459_v47 = vmul.f32 %v1455_v41, %v1455_v41  ;;  %v1464_v63 = vsub.f32 %v1434_v22, %v1455_v41  ;;  %v1465_v0 = vsub.f32 %v1435_v23, %v1455_v41 }
 0x437   : > { %v1450_v40 = vpop.xlane.xlu1 %1449 }
 0x438   : > { %v1456_v43 = vmul.f32 0.00390625, %v1450_v40 }
 0x43a   : > { %v1460_v44 = vsub.f32 %v1456_v43, %v1458_v42 }
 0x43b   : > { %v1453_v45 = vpop.xlane.xlu1 %1452 }
 0x43c   : > { %v1466_v46 = vadd.f32 1e-05, %v1460_v44  ;;  %v1457_v48 = vmul.f32 0.00390625, %v1453_v45 }
 0x43e   : > { %2026 = vrsqrt.f32 %v1466_v46  ;;  %v1461_v49 = vsub.f32 %v1457_v48, %v1459_v47 }
 0x440   : > { %v1467_v50 = vadd.f32 1e-05, %v1461_v49 }
 0x442   : > { %2028 = vrsqrt.f32 %v1467_v50 }
 0x448   : > { %v2027_v56 = vpop.eup %2026 }
 0x449   : > { %v1470_v60 = vmul.f32 %v2027_v56, %v1462_v26  ;;  %v1471_v62 = vmul.f32 %v2027_v56, %v1463_v53 }
 0x44b   : > { %v1485_v61 = vmul.f32 %v1478_v54, %v1470_v60  ;;  %v1486_v33 = vmul.f32 %v1482_v55, %v1471_v62 }
 0x44c   : > { %v2029_v4 = vpop.eup %2028 }
 0x44d   : > { %v1500_v1 = vadd.f32 %v1493_v57, %v1485_v61  ;;  %v1501_v32 = vadd.f32 %v1497_v58, %v1486_v33  ;;  %v1472_v5 = vmul.f32 %v2029_v4, %v1464_v63  ;;  %v1473_v15 = vmul.f32 %v2029_v4, %v1465_v0 }
 0x44f   : > { %v1518_v6 = vmul.f32 %v1516_v35, %v1500_v1  ;;  %v1519_v18 = vmul.f32 %v1516_v35, %v1501_v32  ;;  %v1487_v7 = vmul.f32 %v1478_v54, %v1472_v5  ;;  %v1488_v16 = vmul.f32 %v1482_v55, %v1473_v15 }
 0x451   : > { %v1502_v9 = vadd.f32 %v1493_v57, %v1487_v7  ;;  %v1503_v10 = vadd.f32 %v1497_v58, %v1488_v16  ;;  %1522 = vst [vmem:[%s384_s17] sm:$0xff] %v1518_v6  ;;  %1523 = vst [vmem:[%s384_s17 + $0x8] sm:$0xff] %v1519_v18 }
 0x453   : > { %v1520_v2 = vmul.f32 %v1517_v8, %v1502_v9  ;;  %v1521_v3 = vmul.f32 %v1517_v8, %v1503_v10 }
 0x455   : > { %1524 = vst [vmem:[%s384_s17 + $0x10] sm:$0xff] %v1520_v2  ;;  %1525 = vst [vmem:[%s384_s17 + $0x18] sm:$0xff] %v1521_v3 }
 0x456   : > { %2139 = shalt.err (!%p2136_p4)
}
 0x457   : > { %s2140_s11 = scalar_lea.hbm %s2587_s21, 512  ;;  %s2144_s17 = scalar_lea.hbm %s2643_s10, 1024 }
 0x458   : > { %p2141_p2 = scmp.ne.s32.totalorder %s2587_s21, %s2140_s11  ;;  %p2145_p7 = scmp.lt.u32.totalorder %s2587_s21, %s2643_s10 }
 0x459   : > { %p2146_p8 = scmp.lt.u32.totalorder %s2144_s17, %s2140_s11  ;;  %p2148_p11 = scmp.lt.u32.totalorder %s2140_s11, %s2587_s21 }
 0x45a   : > { %p2142_p9 = pnand %p2141_p2, %p2663_p3 }
 0x45b   : > { %p2147_p0 = por %p2146_p8, %p2145_p7 }
 0x45c   : > { %p2143_p13 = pneg %p2142_p9 }
 0x45d   : > { %p2149_p5 = por %p2148_p11, %p2147_p0 }
 0x45f   : > { %p2150_p6 = pnand %p2149_p5, %p2143_p13 }
 0x461   : > { %2153 = shalt.err (!%p2150_p6)
}
 0x462   : > { %s2212_s22 = smov 256   ;;  %s2213_s15 = smov 16  }
 0x463   : > { %1783 = dma.vmem_to_hbm [thread:$0]  (%p2663_p3), %s2589_s12, 512, %s2587_s21, %s1527_s0, %s2212_s22, %s2212_s22, %s2213_s15  }
 0x464 PF: > { %s2664_s28 = sld [smem:[#allocation15_spill]]  ;;  %s1555_s30 = sand.u32 1, %s2186_s23  }
 0x465   : > { %p2666_p12 = scmp.ge.s32.totalorder %s2198_s26, 2  ;;  %s1556_s11 = scalar_lea.sflag [#allocation6], %s1555_s30 }
 0x46a   : > { %p2665_p10 = scmp.ne.s32.totalorder %s2664_s28, 0 }
 0x46c   : > { %p1797_p1 = pnand %p2666_p12, %p2665_p10 }
 0x46e   : > { %2181 = dma.done.wait (!%p1797_p1), %s1556_s11, 512  }
 0x46f   : > { %2183 = vsyncadd (!%p1797_p1), %s1556_s11, 4294966784  ;;  %p28_p4 = scmp.ge.s32.totalorder %s2397_s13, 4   ;;  %s2667_s23 = smov %s2190_s24 }
 0x470   : > { %s2668_s24 = smov %s2194_s25  ;;  %s2669_s25 = smov %s2413_s20 }
 0x471   : > { %s2670_s26 = smov %s2397_s13  ;;  %30 = sbr.rel (!%p28_p4) target bundleno = 18 (0x12), region = 109 }
 0x478   :  { %1561 = vsyncpa [#allocation5], 1 }
 0x479   :  { %1563 = vsyncpa [#allocation5 + $0x1], 1 }
 0x47a   :  { %1564 = vsyncpa [#allocation8], 1 }
 0x47b   :  { %1565 = vsyncpa [#allocation6], 1 }
 0x47c   :  { %1567 = vsyncpa [#allocation6 + $0x1], 1 }

</bundles_post_ra>
